<compile_context>
chip_gen: v7x
topology: tpu7x:2x2x1
jax: 0.10.0
libtpu: 0.0.40
codegen_flags: <defaults>
</compile_context>

<pallas_src>
import functools

import jax
import jax.numpy as jnp
from jax.experimental import pallas as pl
from jax.experimental.pallas import tpu as pltpu


def _pick_tile(n, max_tile):
    """Largest tile <= max_tile that divides n; otherwise the full dim."""
    for t in (256, 128, 64, 32, 16, 8):
        if t <= max_tile and t <= n and n % t == 0:
            return t
    return n


def _tpu_config():
    """Generation-aware (tile cap, vmem limit).

    v5e/v6e have 128 MiB VMEM per core -> big tiles, high scoped limit.
    v7x has 64 MiB per TensorCore -> 128-wide tiles, <=48 MiB limit.
    Falls back to the conservative (v7x-safe) setting if the query fails.
    """
    vmem_cap = 64 << 20
    try:
        info = pltpu.get_tpu_info()
        vmem_cap = int(getattr(info, "vmem_capacity_bytes", vmem_cap))
    except Exception:
        pass
    if vmem_cap >= (96 << 20):          # v5e / v6e
        return 256, 96 << 20
    return 128, 48 << 20                # v7x / unknown


# ---------------------------------------------------------------------------
# Kernel 1: LayerNorm (once per row tile) + full-width QKV projection.
# Output: combined head-major qkv (B, H, S, 3*Dh) bf16, Q columns pre-scaled.
# ---------------------------------------------------------------------------
def ln_qkv_kernel(x_ref, g_ref, b_ref, w_ref, bqkv_ref, qkv_ref, *, eps, num_heads):
    # x_ref:    (1, TM, E)  f32
    # w_ref:    (E, 3E)     bf16   columns ordered [head0: q|k|v, head1: q|k|v, ...]
    # bqkv_ref: (1, 3E)     f32
    # qkv_ref:  (1, H, TM, 3*Dh) bf16
    x = x_ref[0].astype(jnp.float32)                        # (TM, E)

    # LayerNorm statistics in f32 (computed exactly once per row tile).
    mu = jnp.mean(x, axis=-1, keepdims=True)
    var = jnp.mean(jnp.square(x - mu), axis=-1, keepdims=True)
    xn = (x - mu) * jax.lax.rsqrt(var + eps)
    xn = xn * g_ref[...] + b_ref[...]                       # (TM, E) f32

    # One full-width bf16 MXU matmul (N = 3E), f32 accumulation.
    y = jnp.dot(xn.astype(jnp.bfloat16), w_ref[...],
                preferred_element_type=jnp.float32)         # (TM, 3E)
    y = y + bqkv_ref[...]

    # Store per head: columns [h*3Dh:(h+1)*3Dh] -> qkv[0, h] (lane width 3*Dh).
    d3 = qkv_ref.shape[-1]                                  # 3*Dh
    for h in range(num_heads):
        qkv_ref[0, h] = y[:, h * d3:(h + 1) * d3].astype(qkv_ref.dtype)


# ---------------------------------------------------------------------------
# Kernel 2: batched-over-heads flash attention + fused output projection.
# ---------------------------------------------------------------------------
def attn_out_kernel(q_ref, kv_ref, wo_ref, bo_ref, o_ref, m_sc, l_sc, acc_sc,
                    *, num_heads, head_dim):
    # q_ref:  (1, H, TQ, 3*Dh) bf16 (only the q slice is used; Q pre-scaled)
    # kv_ref: (1, H, TK, 3*Dh) bf16
    # wo_ref: (H, Dh, E) bf16   bo_ref: (1, E) f32   o_ref: (1, TQ, E)
    # scratch: m_sc/l_sc (H, TQ, 1) f32, acc_sc (H, TQ, Dh) f32
    ki = pl.program_id(2)
    nk = pl.num_programs(2)

    @pl.when(ki == 0)
    def _():
        m_sc[...] = jnp.full(m_sc.shape, -jnp.inf, m_sc.dtype)
        l_sc[...] = jnp.zeros(l_sc.shape, l_sc.dtype)
        acc_sc[...] = jnp.zeros(acc_sc.shape, acc_sc.dtype)

    dh = head_dim
    q = q_ref[0][:, :, 0:dh]                                 # (H, TQ, Dh) bf16
    kv = kv_ref[0]                                           # (H, TK, 3*Dh) bf16
    k = kv[:, :, dh:2 * dh]                                  # (H, TK, Dh)
    v = kv[:, :, 2 * dh:3 * dh]                              # (H, TK, Dh)

    # Batched-over-heads score matmul on the MXU (no per-head Python loop here).
    s = jnp.einsum("hqd,hkd->hqk", q, k,
                   preferred_element_type=jnp.float32)       # (H, TQ, TK) f32

    # Online softmax (f32).
    m_prev = m_sc[...]
    m_new = jnp.maximum(m_prev, jnp.max(s, axis=-1, keepdims=True))
    alpha = jnp.exp(m_prev - m_new)                          # (H, TQ, 1)
    p = jnp.exp(s - m_new)                                   # (H, TQ, TK) f32
    l_sc[...] = alpha * l_sc[...] + jnp.sum(p, axis=-1, keepdims=True)
    acc_sc[...] = alpha * acc_sc[...] + jnp.einsum(
        "hqk,hkd->hqd", p.astype(v.dtype), v,
        preferred_element_type=jnp.float32)                  # (H, TQ, Dh) f32
    m_sc[...] = m_new

    @pl.when(ki == nk - 1)
    def _():
        ctx = (acc_sc[...] * pl.reciprocal(l_sc[...], approx=True)
               ).astype(wo_ref.dtype)                        # (H, TQ, Dh) bf16
        tq = ctx.shape[1]
        e = wo_ref.shape[-1]
        # Fused output projection accumulated head-by-head into a single (TQ, E)
        # f32 register: never materializes an (H, TQ, E) temporary.
        out = jnp.zeros((tq, e), jnp.float32)
        for h in range(num_heads):
            out = out + jnp.dot(ctx[h], wo_ref[h],
                                preferred_element_type=jnp.float32)
        o_ref[0] = (out + bo_ref[...]).astype(o_ref.dtype)


# ---------------------------------------------------------------------------
# Host-side weight preparation (done ONCE, reused across calls).
# ---------------------------------------------------------------------------
def prepare_mhsa_params(params, *, num_heads):
    E = params["ln_weight"].shape[0]
    H = num_heads
    assert E % H == 0
    Dh = E // H
    scale = float(Dh) ** -0.5

    W_in = params["in_proj_weight"]                          # (3E, E)
    b_in = params["in_proj_bias"]                            # (3E,)

    # Column order of the combined weight: [h0: q|k|v, h1: q|k|v, ...]
    Wq = (W_in[:E].T * scale).reshape(E, H, Dh)              # fold 1/sqrt(Dh) into Q
    Wk = W_in[E:2 * E].T.reshape(E, H, Dh)
    Wv = W_in[2 * E:].T.reshape(E, H, Dh)
    w_qkv = jnp.concatenate([Wq, Wk, Wv], axis=-1).reshape(E, 3 * E).astype(jnp.bfloat16)

    bq = (b_in[:E] * scale).reshape(H, Dh)
    bk = b_in[E:2 * E].reshape(H, Dh)
    bv = b_in[2 * E:].reshape(H, Dh)
    b_qkv = jnp.concatenate([bq, bk, bv], axis=-1).reshape(1, 3 * E).astype(jnp.float32)

    wo = params["out_proj_weight"].T.reshape(H, Dh, E).astype(jnp.bfloat16)
    bo = params["out_proj_bias"].reshape(1, E).astype(jnp.float32)
    gamma = params["ln_weight"].reshape(1, E).astype(jnp.float32)
    beta = params["ln_bias"].reshape(1, E).astype(jnp.float32)
    return dict(w_qkv=w_qkv, b_qkv=b_qkv, wo=wo, bo=bo, gamma=gamma, beta=beta)


# ---------------------------------------------------------------------------
# Wrapper
# ---------------------------------------------------------------------------
def multi_head_self_attention_block(x, prepped, *, num_heads, eps: float = 1e-5):
    """x: (B, S, E) float32. `prepped` comes from prepare_mhsa_params()."""
    B, S, E = x.shape
    H = num_heads
    assert E % H == 0
    Dh = E // H

    max_tile, vmem_limit = _tpu_config()
    TM = _pick_tile(S, max_tile)       # row tile for LN/QKV
    TQ = _pick_tile(S, max_tile)       # query tile
    TK = _pick_tile(S, max_tile)       # key tile

    # ----- Kernel 1: LN (once per tile) + full-width QKV, combined output ----
    qkv = pl.pallas_call(
        functools.partial(ln_qkv_kernel, eps=eps, num_heads=H),
        out_shape=jax.ShapeDtypeStruct((B, H, S, 3 * Dh), jnp.bfloat16),
        grid=(B, S // TM),
        in_specs=[
            pl.BlockSpec((1, TM, E), lambda b, si: (b, si, 0)),        # x
            pl.BlockSpec((1, E), lambda b, si: (0, 0)),                # ln gamma
            pl.BlockSpec((1, E), lambda b, si: (0, 0)),                # ln beta
            pl.BlockSpec((E, 3 * E), lambda b, si: (0, 0)),            # W_qkv (full width)
            pl.BlockSpec((1, 3 * E), lambda b, si: (0, 0)),            # b_qkv
        ],
        out_specs=pl.BlockSpec((1, H, TM, 3 * Dh), lambda b, si: (b, 0, si, 0)),
        compiler_params=pltpu.CompilerParams(
            dimension_semantics=("parallel", "parallel"),
            vmem_limit_bytes=vmem_limit),
    )(x, prepped["gamma"], prepped["beta"], prepped["w_qkv"], prepped["b_qkv"])

    # ----- Kernel 2: flash attention (all heads batched) + output proj -------
    # Note: wo/bo have constant index maps; pipeline_mode=pl.Buffered(1) would
    # save their double-buffer VMEM on v7x but is omitted for lowering portability.
    out = pl.pallas_call(
        functools.partial(attn_out_kernel, num_heads=H, head_dim=Dh),
        out_shape=jax.ShapeDtypeStruct((B, S, E), x.dtype),
        grid=(B, S // TQ, S // TK),
        in_specs=[
            pl.BlockSpec((1, H, TQ, 3 * Dh), lambda b, qi, ki: (b, 0, qi, 0)),  # q rows
            pl.BlockSpec((1, H, TK, 3 * Dh), lambda b, qi, ki: (b, 0, ki, 0)),  # k/v rows
            pl.BlockSpec((H, Dh, E), lambda b, qi, ki: (0, 0, 0)),              # Wo
            pl.BlockSpec((1, E), lambda b, qi, ki: (0, 0)),                     # bo
        ],
        out_specs=pl.BlockSpec((1, TQ, E), lambda b, qi, ki: (b, qi, 0)),
        scratch_shapes=[
            pltpu.VMEM((H, TQ, 1), jnp.float32),    # running max
            pltpu.VMEM((H, TQ, 1), jnp.float32),    # running sum
            pltpu.VMEM((H, TQ, Dh), jnp.float32),   # context accumulator
        ],
        compiler_params=pltpu.CompilerParams(
            dimension_semantics=("parallel", "parallel", "arbitrary"),
            vmem_limit_bytes=vmem_limit),
    )(qkv, qkv, prepped["wo"], prepped["bo"])
    return out


# ---------------------------------------------------------------------------
# Plain-JAX reference (mirrors nn.LayerNorm + nn.MultiheadAttention forward)
# ---------------------------------------------------------------------------
def reference_jax(x, params, *, num_heads: int):
    B, S, E = x.shape
    Dh = E // num_heads
    mu = jnp.mean(x, axis=-1, keepdims=True)
    var = jnp.mean((x - mu) ** 2, axis=-1, keepdims=True)
    xn = (x - mu) / jnp.sqrt(var + 1e-5)
    xn = xn * params["ln_weight"] + params["ln_bias"]
    qkv = xn @ params["in_proj_weight"].T + params["in_proj_bias"]
    q, k, v = jnp.split(qkv, 3, axis=-1)

    def split_heads(t):
        return t.reshape(B, S, num_heads, Dh).transpose(0, 2, 1, 3)

    qh, kh, vh = split_heads(q), split_heads(k), split_heads(v)
    scores = jnp.einsum("bhqd,bhkd->bhqk", qh, kh) / jnp.sqrt(Dh)
    p = jax.nn.softmax(scores, axis=-1)
    oh = jnp.einsum("bhqk,bhkd->bhqd", p, vh)
    o = oh.transpose(0, 2, 1, 3).reshape(B, S, E)
    return o @ params["out_proj_weight"].T + params["out_proj_bias"]


if __name__ == "__main__":
    B, S, E, H = 2, 8, 32, 4   # batch, seq, embedding_dim, num_heads (Dh = 8)

    key = jax.random.PRNGKey(0)
    kx, k1, k2, k3, k4 = jax.random.split(key, 5)

    x = jax.random.normal(kx, (B, S, E), dtype=jnp.float32)

    params = {
        "ln_weight": jnp.ones((E,), jnp.float32),
        "ln_bias": jnp.zeros((E,), jnp.float32),
        "in_proj_weight": jax.random.normal(k1, (3 * E, E), jnp.float32) * 0.1,
        "in_proj_bias": jax.random.normal(k2, (3 * E,), jnp.float32) * 0.01,
        "out_proj_weight": jax.random.normal(k3, (E, E), jnp.float32) * 0.1,
        "out_proj_bias": jax.random.normal(k4, (E,), jnp.float32) * 0.01,
    }

    # Weight prep is hoisted: done once here, reused by every forward call.
    prepped = prepare_mhsa_params(params, num_heads=H)

    out = multi_head_self_attention_block(x, prepped, num_heads=H)
    out = jax.block_until_ready(out)

    ref = reference_jax(x, params, num_heads=H)
    assert out.shape == (B, S, E)
    # bf16 MXU operands + approx reciprocal -> loosened tolerance vs f32 reference.
    max_err = float(jnp.max(jnp.abs(out - ref)))
    assert jnp.allclose(out, ref, atol=2e-2, rtol=2e-2), f"mismatch, max abs err {max_err}"

    print("KERNEL_OK")
</pallas_src>

<mosaic_0001>
module attributes {stable_mosaic.version = 11 : i64} {
  func.func @ln_qkv_kernel(%arg0: i32, %arg1: i32, %arg2: memref<1x8x32xf32, #tpu.memory_space<vmem>>, %arg3: memref<1x32xf32, #tpu.memory_space<vmem>>, %arg4: memref<1x32xf32, #tpu.memory_space<vmem>>, %arg5: memref<32x96xbf16, #tpu.memory_space<vmem>>, %arg6: memref<1x96xf32, #tpu.memory_space<vmem>>, %arg7: memref<1x4x8x24xbf16, #tpu.memory_space<vmem>>) attributes {dimension_semantics = [#tpu.dimension_semantics<parallel>, #tpu.dimension_semantics<parallel>], iteration_bounds = array<i64: 2, 1>, scalar_prefetch = 0 : i64, scratch_operands = 0 : i64, tpu.core_type = #tpu.core_type<tc>, window_params = [{transform_indices = @transform_0, window_bounds = array<i64: 1, 8, 32>}, {pipeline_mode = #tpu.pipeline_mode<synchronous>, transform_indices = @transform_1, window_bounds = array<i64: 1, 32>}, {pipeline_mode = #tpu.pipeline_mode<synchronous>, transform_indices = @transform_2, window_bounds = array<i64: 1, 32>}, {pipeline_mode = #tpu.pipeline_mode<synchronous>, transform_indices = @transform_3, window_bounds = array<i64: 32, 96>}, {pipeline_mode = #tpu.pipeline_mode<synchronous>, transform_indices = @transform_4, window_bounds = array<i64: 1, 96>}, {transform_indices = @transform_5, window_bounds = array<i64: 1, 4, 8, 24>}]} {
    %c0 = arith.constant 0 : index
    %c0_0 = arith.constant 0 : index
    %c0_1 = arith.constant 0 : index
    %0 = vector.load %arg2[%c0, %c0_0, %c0_1] : memref<1x8x32xf32, #tpu.memory_space<vmem>>, vector<1x8x32xf32>
    %1 = vector.shape_cast %0 : vector<1x8x32xf32> to vector<8x32xf32>
    %cst = arith.constant dense<0.000000e+00> : vector<8xf32>
    %2 = vector.multi_reduction <add>, %1, %cst [1] : vector<8x32xf32> to vector<8xf32>
    %3 = vector.shape_cast %2 : vector<8xf32> to vector<8x1xf32>
    %cst_2 = arith.constant 3.200000e+01 : f32
    %4 = vector.broadcast %cst_2 : f32 to vector<8x1xf32>
    %5 = arith.divf %3, %4 : vector<8x1xf32>
    %6 = vector.broadcast %5 : vector<8x1xf32> to vector<8x32xf32>
    %7 = arith.subf %1, %6 : vector<8x32xf32>
    %8 = arith.mulf %7, %7 : vector<8x32xf32>
    %cst_3 = arith.constant dense<0.000000e+00> : vector<8xf32>
    %9 = vector.multi_reduction <add>, %8, %cst_3 [1] : vector<8x32xf32> to vector<8xf32>
    %10 = vector.shape_cast %9 : vector<8xf32> to vector<8x1xf32>
    %cst_4 = arith.constant 3.200000e+01 : f32
    %11 = vector.broadcast %cst_4 : f32 to vector<8x1xf32>
    %12 = arith.divf %10, %11 : vector<8x1xf32>
    %13 = vector.broadcast %5 : vector<8x1xf32> to vector<8x32xf32>
    %14 = arith.subf %1, %13 : vector<8x32xf32>
    %cst_5 = arith.constant 9.99999974E-6 : f32
    %15 = vector.broadcast %cst_5 : f32 to vector<8x1xf32>
    %16 = arith.addf %12, %15 : vector<8x1xf32>
    %17 = math.rsqrt %16 : vector<8x1xf32>
    %18 = vector.broadcast %17 : vector<8x1xf32> to vector<8x32xf32>
    %19 = arith.mulf %14, %18 : vector<8x32xf32>
    %c0_6 = arith.constant 0 : index
    %c0_7 = arith.constant 0 : index
    %20 = vector.load %arg3[%c0_6, %c0_7] : memref<1x32xf32, #tpu.memory_space<vmem>>, vector<1x32xf32>
    %21 = vector.broadcast %20 : vector<1x32xf32> to vector<8x32xf32>
    %22 = arith.mulf %19, %21 : vector<8x32xf32>
    %c0_8 = arith.constant 0 : index
    %c0_9 = arith.constant 0 : index
    %23 = vector.load %arg4[%c0_8, %c0_9] : memref<1x32xf32, #tpu.memory_space<vmem>>, vector<1x32xf32>
    %24 = vector.broadcast %23 : vector<1x32xf32> to vector<8x32xf32>
    %25 = arith.addf %22, %24 : vector<8x32xf32>
    %26 = arith.truncf %25 : vector<8x32xf32> to vector<8x32xbf16>
    %c0_10 = arith.constant 0 : index
    %c0_11 = arith.constant 0 : index
    %27 = vector.load %arg5[%c0_10, %c0_11] : memref<32x96xbf16, #tpu.memory_space<vmem>>, vector<32x96xbf16>
    %cst_12 = arith.constant dense<0.000000e+00> : vector<8x96xf32>
    %28 = tpu.matmul %26, %27, %cst_12 {dimension_numbers = #tpu.dot_dimension_numbers<[1], [0], [0], [1], [0, 0, 1, 1], [], []>} : vector<8x32xbf16>, vector<32x96xbf16>, vector<8x96xf32> -> vector<8x96xf32>
    %c0_13 = arith.constant 0 : index
    %c0_14 = arith.constant 0 : index
    %29 = vector.load %arg6[%c0_13, %c0_14] : memref<1x96xf32, #tpu.memory_space<vmem>>, vector<1x96xf32>
    %30 = vector.broadcast %29 : vector<1x96xf32> to vector<8x96xf32>
    %31 = arith.addf %28, %30 : vector<8x96xf32>
    %32 = vector.extract_strided_slice %31 {offsets = [0, 0], sizes = [8, 24], strides = [1, 1]} : vector<8x96xf32> to vector<8x24xf32>
    %33 = arith.truncf %32 : vector<8x24xf32> to vector<8x24xbf16>
    %c0_15 = arith.constant 0 : index
    %c0_16 = arith.constant 0 : index
    %c0_17 = arith.constant 0 : index
    %c0_18 = arith.constant 0 : index
    %34 = vector.load %arg7[%c0_15, %c0_16, %c0_17, %c0_18] : memref<1x4x8x24xbf16, #tpu.memory_space<vmem>>, vector<1x1x8x24xbf16>
    %35 = vector.shape_cast %34 : vector<1x1x8x24xbf16> to vector<8x24xbf16>
    %36 = vector.shape_cast %33 : vector<8x24xbf16> to vector<1x1x8x24xbf16>
    tpu.vector_store %arg7[%c0_15, %c0_16, %c0_17, %c0_18], %36 {strides = array<i32>} : memref<1x4x8x24xbf16, #tpu.memory_space<vmem>>, vector<1x1x8x24xbf16>,
    %37 = vector.extract_strided_slice %31 {offsets = [0, 24], sizes = [8, 24], strides = [1, 1]} : vector<8x96xf32> to vector<8x24xf32>
    %38 = arith.truncf %37 : vector<8x24xf32> to vector<8x24xbf16>
    %c0_19 = arith.constant 0 : index
    %c1 = arith.constant 1 : index
    %c0_20 = arith.constant 0 : index
    %c0_21 = arith.constant 0 : index
    %39 = vector.load %arg7[%c0_19, %c1, %c0_20, %c0_21] : memref<1x4x8x24xbf16, #tpu.memory_space<vmem>>, vector<1x1x8x24xbf16>
    %40 = vector.shape_cast %39 : vector<1x1x8x24xbf16> to vector<8x24xbf16>
    %41 = vector.shape_cast %38 : vector<8x24xbf16> to vector<1x1x8x24xbf16>
    tpu.vector_store %arg7[%c0_19, %c1, %c0_20, %c0_21], %41 {strides = array<i32>} : memref<1x4x8x24xbf16, #tpu.memory_space<vmem>>, vector<1x1x8x24xbf16>,
    %42 = vector.extract_strided_slice %31 {offsets = [0, 48], sizes = [8, 24], strides = [1, 1]} : vector<8x96xf32> to vector<8x24xf32>
    %43 = arith.truncf %42 : vector<8x24xf32> to vector<8x24xbf16>
    %c0_22 = arith.constant 0 : index
    %c2 = arith.constant 2 : index
    %c0_23 = arith.constant 0 : index
    %c0_24 = arith.constant 0 : index
    %44 = vector.load %arg7[%c0_22, %c2, %c0_23, %c0_24] : memref<1x4x8x24xbf16, #tpu.memory_space<vmem>>, vector<1x1x8x24xbf16>
    %45 = vector.shape_cast %44 : vector<1x1x8x24xbf16> to vector<8x24xbf16>
    %46 = vector.shape_cast %43 : vector<8x24xbf16> to vector<1x1x8x24xbf16>
    tpu.vector_store %arg7[%c0_22, %c2, %c0_23, %c0_24], %46 {strides = array<i32>} : memref<1x4x8x24xbf16, #tpu.memory_space<vmem>>, vector<1x1x8x24xbf16>,
    %47 = vector.extract_strided_slice %31 {offsets = [0, 72], sizes = [8, 24], strides = [1, 1]} : vector<8x96xf32> to vector<8x24xf32>
    %48 = arith.truncf %47 : vector<8x24xf32> to vector<8x24xbf16>
    %c0_25 = arith.constant 0 : index
    %c3 = arith.constant 3 : index
    %c0_26 = arith.constant 0 : index
    %c0_27 = arith.constant 0 : index
    %49 = vector.load %arg7[%c0_25, %c3, %c0_26, %c0_27] : memref<1x4x8x24xbf16, #tpu.memory_space<vmem>>, vector<1x1x8x24xbf16>
    %50 = vector.shape_cast %49 : vector<1x1x8x24xbf16> to vector<8x24xbf16>
    %51 = vector.shape_cast %48 : vector<8x24xbf16> to vector<1x1x8x24xbf16>
    tpu.vector_store %arg7[%c0_25, %c3, %c0_26, %c0_27], %51 {strides = array<i32>} : memref<1x4x8x24xbf16, #tpu.memory_space<vmem>>, vector<1x1x8x24xbf16>,
    return
  }
  func.func @transform_0(%arg0: i32, %arg1: i32) -> (i32, i32, i32) {
    %c0_i32 = arith.constant 0 : i32
    %c0_i32_0 = arith.constant 0 : i32
    return %arg0, %arg1, %c0_i32 : i32, i32, i32
  }
  func.func @transform_1(%arg0: i32, %arg1: i32) -> (i32, i32) {
    %c0_i32 = arith.constant 0 : i32
    %c0_i32_0 = arith.constant 0 : i32
    %c0_i32_1 = arith.constant 0 : i32
    return %c0_i32, %c0_i32_0 : i32, i32
  }
  func.func @transform_2(%arg0: i32, %arg1: i32) -> (i32, i32) {
    %c0_i32 = arith.constant 0 : i32
    %c0_i32_0 = arith.constant 0 : i32
    %c0_i32_1 = arith.constant 0 : i32
    return %c0_i32, %c0_i32_0 : i32, i32
  }
  func.func @transform_3(%arg0: i32, %arg1: i32) -> (i32, i32) {
    %c0_i32 = arith.constant 0 : i32
    %c0_i32_0 = arith.constant 0 : i32
    %c0_i32_1 = arith.constant 0 : i32
    return %c0_i32, %c0_i32_0 : i32, i32
  }
  func.func @transform_4(%arg0: i32, %arg1: i32) -> (i32, i32) {
    %c0_i32 = arith.constant 0 : i32
    %c0_i32_0 = arith.constant 0 : i32
    %c0_i32_1 = arith.constant 0 : i32
    return %c0_i32, %c0_i32_0 : i32, i32
  }
  func.func @transform_5(%arg0: i32, %arg1: i32) -> (i32, i32, i32, i32) {
    %c0_i32 = arith.constant 0 : i32
    %c0_i32_0 = arith.constant 0 : i32
    %c0_i32_1 = arith.constant 0 : i32
    return %arg0, %c0_i32, %arg1, %c0_i32_0 : i32, i32, i32, i32
  }
}

</mosaic_0001>

<bundles_post_ra>
// kernel: tpu_custom_call.1
= control target key start
LH: loop header
LB: loop body
LE: loop exit
PB: predicated region body
PF: predicated region fallthrough
CT: control target
= control target key end

     0   :  { %10 = vsyncpa [#allocation3], 0  ;;  %s1048_s0 = inlined_call_operand.hbm [shape: f32[2,8,32], index: 0, kind: input, shape index: {}]   ;;  %s1049_s1 = inlined_call_operand.vmem [shape: f32[1,32], index: 1, kind: input, shape index: {}]   ;;  %s1050_s2 = inlined_call_operand.vmem [shape: f32[1,32], index: 2, kind: input, shape index: {}]   ;;  %s1051_s3 = inlined_call_operand.hbm [shape: bf16[32,96], index: 3, kind: input, shape index: {}]   ;;  %s1052_s4 = inlined_call_operand.vmem [shape: f32[1,96], index: 4, kind: input, shape index: {}]   ;;  %s1053_s5 = inlined_call_operand.hbm [shape: bf16[2,4,8,24], index: 5, kind: output, shape index: {}]  }
   0x1   :  { %12 = vsyncpa [#allocation3 + $0x1], 0 }
   0x2   :  { %13 = vsyncpa [#allocation6], 0 }
   0x3   :  { %14 = vsyncpa [#allocation4], 0 }
   0x4   :  { %16 = vsyncpa [#allocation4 + $0x1], 0  ;;  %s815_s18 = smov 0   ;;  %s817_s19 = smov 0  }
   0x5   :  { %s819_s20 = smov 0   ;;  %s821_s21 = smov 0  }
   0x6   :  { %s823_s22 = smov 0   ;;  %s825_s23 = smov 0  }
   0x7 LB: > { %s502_s24 = sadd.s32 4294967295, %s771_s23   ;;  %s503_s25 = sadd.s32 4294967294, %s771_s23   ;;  %s771_s23 = sphi %s825_s23, %s22_s23   ;;  %s767_s22 = sphi %s823_s22, %s1077_s22   ;;  %s763_s21 = sphi %s821_s21, %s1076_s21   ;;  %s759_s20 = sphi %s819_s20, %s1075_s20   ;;  %s755_s19 = sphi %s817_s19, %s1074_s19   ;;  %s751_s18 = sphi %s815_s18, %s1073_s18  }
   0x8   : > { %p56_p0 = scmp.ne.s32.totalorder %s755_s19, %s751_s18  ;;  %p849_p1 = scmp.eq.s32.totalorder %s502_s24, 0 }
   0x9   : > { %p853_p2 = scmp.eq.s32.totalorder %s502_s24, 1  ;;  %p172_p3 = scmp.eq.s32.totalorder %s503_s25, 1 }
   0xa   : > { %s1058_s26 = scalar_select %p849_p1, 1, 0 }
   0xb   : > { %s1059_s27 = scalar_select %p853_p2, 1, 0 }
   0xc   : > { %p859_p4 = por %p849_p1, %p56_p0  ;;  %p504_p5 = scmp.ge.s32.totalorder %s771_s23, 1 }
   0xd   : > { %p864_p6 = por %p172_p3, %p56_p0  ;;  %p179_p7 = scmp.lt.s32.totalorder %s771_s23, 3 }
   0xe   : > { %s1060_s28 = scalar_select %p859_p4, 1, 0 }
   0xf   : > { %s1061_s29 = scalar_select %p864_p6, 1, 0 }
  0x10   : > { %p869_p8 = pnand %p504_p5, %p179_p7  ;;  %s773_s6 = smov [#allocation5]  }
  0x11   : > { %s197_s7 = sshll.u32 %s773_s6, 4  ;;  %s34_s9 = sadd.s32 1, %s767_s22  ;;  %s198_s7 = int_to_ptr.vmem [resolvable:$true] %s197_s7 }
  0x12   : > { %s1062_s30 = scalar_select %p869_p8, 1, 0 }
  0x13   : > { %p549_p9 = pneg %p869_p8  ;;  %s627_s12 = scalar_lea.hbm %s1051_s3, 256 }
  0x14   : > { %p628_p12 = scmp.ne.s32.totalorder %s1051_s3, %s627_s12  ;;  %p634_p5 = scmp.lt.u32.totalorder %s627_s12, %s1051_s3 }
  0x15   : > { %p878_p11 = pnand %p549_p9, %p849_p1 }
  0x17   : > { %p629_p13 = pneg %p878_p11 }
  0x19   : > { %p630_p0 = pnand %p629_p13, %p628_p12 }
  0x1b   : > { %p631_p3 = pneg %p630_p0 }
  0x1d   : > { %p636_p7 = pnand %p634_p5, %p631_p3 }
  0x1f   : > { %639 = shalt.err (!%p636_p7)
}
  0x20   : > { %s640_s17 = scalar_lea.vmem %s198_s7, 256  ;;  %p648_p1 = scmp.lt.s32.totalorder %s198_s7, %s198_s7 }
  0x21   : > { %p641_p9 = scmp.ne.s32.totalorder %s198_s7, %s640_s17  ;;  %p649_p4 = scmp.lt.s32.totalorder %s640_s17, %s640_s17 }
  0x23   : > { %p643_p10 = pnand %p641_p9, %p629_p13  ;;  %p650_p8 = por %p649_p4, %p648_p1 }
  0x25   : > { %p644_p6 = pneg %p643_p10 }
  0x27   : > { %p651_p2 = pnand %p650_p8, %p644_p6 }
  0x29   : > { %654 = shalt.err (!%p651_p2)
}
  0x2a   : > { %s774_s24 = smov 64   ;;  %s775_s25 = smov 4  }
  0x2b   : > { %552 = dma.hbm_to_vmem [thread:$0]  (!%p878_p11), %s1051_s3, 256, %s198_s7, [#allocation6], %s774_s24, %s774_s24, %s775_s25  }
  0x2c   : > { %p36_p1 = scmp.ge.s32.totalorder %s34_s9, 2  ;;  %s43_s11 = sadd.s32 1, %s759_s20 }
  0x2d   : > { %p50_p2 = scmp.ne.s32.totalorder %s759_s20, %s755_s19  ;;  %p51_p4 = scmp.eq.s32.totalorder %s771_s23, 0 }
  0x2e   : > { %s1079_s9 = smov (%p36_p1, %s34_s9), 0  ;;  %p1065_p8 = scmp.ne.s32.totalorder %s1059_s27, 0 }
  0x2f   : > { %p905_p6 = por %p51_p4, %p50_p2  ;;  %s38_s8 = ssub.s32 %s767_s22, %s1079_s9 }
  0x30   : > { %p911_p10 = por %p1065_p8, %p50_p2  ;;  %p562_p12 = scmp.lt.s32.totalorder %s771_s23, 2 }
  0x31   : > { %p41_p11 = scmp.eq.s32.totalorder %s38_s8, 0  ;;  %s214_s7 = sand.u32 1, %s759_s20  }
  0x32   : > { %s507_s14 = sshll.u32 %s214_s7, 3  ;;  %s508_s16 = sshll.u32 %s767_s22, 7 }
  0x33   : > { %s920_s15 = scalar_select %p41_p11, %s759_s20, %s43_s11  }
  0x34   : > { %s926_s25 = scalar_lea.hbm %s1048_s0, %s508_s16  ;;  %s218_s27 = scalar_lea.vmem [#allocation2], %s507_s14 }
  0x35   : > { %s226_s6 = sshll.u32 %s218_s27, 4  ;;  %p932_p13 = pnand %p562_p12, %p905_p6  ;;  %s928_s6 = int_to_ptr.vmem [resolvable:$true] %s226_s6 }
  0x36   : > { %s215_s11 = scalar_lea.sflag [#allocation3], %s214_s7  ;;  %s655_s8 = scalar_lea.hbm %s926_s25, 128 }
  0x37   : > { %p656_p0 = scmp.ne.s32.totalorder %s926_s25, %s655_s8  ;;  %p657_p3 = pneg %p932_p13 }
  0x38   : > { %s660_s17 = scalar_lea.hbm %s1048_s0, 256  ;;  %p661_p9 = scmp.lt.u32.totalorder %s926_s25, %s1048_s0 }
  0x39   : > { %p658_p5 = pnand %p657_p3, %p656_p0  ;;  %p662_p1 = scmp.lt.u32.totalorder %s660_s17, %s655_s8 }
  0x3a   : > { %p664_p4 = scmp.lt.u32.totalorder %s655_s8, %s926_s25 }
  0x3b   : > { %p659_p7 = pneg %p658_p5  ;;  %p663_p2 = por %p662_p1, %p661_p9 }
  0x3d   : > { %p665_p6 = por %p664_p4, %p663_p2 }
  0x3f   : > { %p666_p8 = pnand %p665_p6, %p659_p7 }
  0x41   : > { %669 = shalt.err (!%p666_p8)
}
  0x42   : > { %s670_s7 = scalar_lea.vmem %s928_s6, 128  ;;  %s776_s27 = smov [#allocation2]  }
  0x43   : > { %p671_p12 = scmp.ne.s32.totalorder %s928_s6, %s670_s7  ;;  %s675_s14 = sshll.u32 %s776_s27, 4  ;;  %s676_s14 = int_to_ptr.vmem [resolvable:$false] %s675_s14 }
  0x44   : > { %s677_s16 = scalar_lea.vmem %s676_s14, 256  ;;  %p678_p5 = scmp.lt.s32.totalorder %s928_s6, %s676_s14 }
  0x45   : > { %p673_p11 = pnand %p671_p12, %p657_p3  ;;  %p679_p9 = scmp.lt.s32.totalorder %s677_s16, %s670_s7 }
  0x47   : > { %p674_p0 = pneg %p673_p11  ;;  %p680_p1 = por %p679_p9, %p678_p5 }
  0x49   : > { %p681_p2 = pnand %p680_p1, %p674_p0 }
  0x4b   : > { %684 = shalt.err (!%p681_p2)
}
  0x4c   : > { %556 = dma.hbm_to_vmem [thread:$0]  (!%p932_p13), %s926_s25, 128, %s928_s6, %s215_s11  }
  0x4d   : > { %p1068_p7 = scmp.ne.s32.totalorder %s1062_s30, 0 }
  0x4e   : > { %s964_s8 = sand.u32 (!%p1068_p7), 1, %s755_s19   ;;  %p1069_p3 = scmp.ne.s32.totalorder (!%p1068_p7), %s1060_s28, 0 }
  0x4f   : > { %235 = sbr.rel (%p1068_p7) target bundleno = 756 (0x2f4), region = 40  ;;  %s510_s17 = sshll.u32 (!%p1068_p7), %s964_s8, 3 }
  0x50   : > { %s238_s12 = scalar_lea.sflag (!%p1068_p7), [#allocation3], %s964_s8  ;;  %s241_s24 = scalar_lea.vmem (!%p1068_p7), [#allocation2], %s510_s17 }
  0x56   : > { %738 = dma.done.wait (%p1069_p3), %s238_s12, 128  }
  0x57   : > { %740 = vsyncadd (%p1069_p3), %s238_s12, 4294967168  ;;  %p1070_p4 = scmp.ne.s32.totalorder %s1058_s26, 0 }
  0x59   : > { %742 = dma.done.wait (%p1070_p4), [#allocation6], 256  }
  0x5a   : > { %744 = vsyncadd (%p1070_p4), [#allocation6], 4294967040  ;;  %vm274_vm0 = vcmask 261120   ;;  %v273_v0 = vld [vmem:[%s241_s24] sm:$0xff]  ;;  %v623_v7 = vld [vmem:[#allocation5] sm:$0xff]   ;;  %v777_v8 = vmov 0.0  }
  0x5b   : > { %v275_v1 = vsel %vm274_vm0, %v273_v0, 0.0  ;;  %533 = vmatprep.subr.bf16.mxu0 %v777_v8  ;;  %vm778_vm1 = vmmov 0   ;;  %v624_v9 = vld [vmem:[#allocation5 + $0x8] sm:$0xff]   ;;  %v513_v14 = vld [vmem:[%s1049_s1] ss:$0 sm:$0xff]  ;;  %s512_s11 = sshll.u32 %s964_s8, 4 }
  0x5c   : > { %276 = vadd.xlane.f32.xlu0 %v275_v1  ;;  %537 = vmatprep.mubr.msk.bf16.mxu0 %vm778_vm1, %v777_v8  ;;  %v514_v16 = vld [vmem:[%s1050_s2] ss:$0 sm:$0xff]  ;;  %vm373_vm2 = vcmask 191488   ;;  %s779_s7 = smov 56   ;;  %s780_s27 = smov 104  }
  0x5d   : > { %534 = vmatpush3.bf16.msra.mxu0 %v623_v7  ;;  %v515_v20 = vld [vmem:[%s1052_s4] ss:$0 sm:$0xff]  ;;  %s271_s14 = scalar_lea.vmem [#allocation7], %s512_s11  ;;  %s781_s16 = smov 80  }
  0x5e   : > { %535 = vmatprep.subr.bf16.mxu0 %v777_v8  ;;  %s408_s17 = sshll.u32 %s271_s14, 4  ;;  %s529_s12 = sshll.u32 %s763_s21, 8  ;;  %s991_s17 = int_to_ptr.vmem [resolvable:$true] %s408_s17 }
  0x5f   : > { %s998_s28 = scalar_lea.hbm %s1053_s5, %s529_s12  ;;  %s394_s21 = scalar_lea.sflag [#allocation4], %s964_s8 }
  0x60   : > { %s685_s30 = scalar_lea.vmem %s991_s17, 256  ;;  %s782_s25 = smov [#allocation7]  }
  0x61   : > { %536 = vmatpush3.bf16.msra.mxu0 %v624_v9  ;;  %p686_p13 = scmp.ne.s32.totalorder %s991_s17, %s685_s30  ;;  %s689_s6 = sshll.u32 %s782_s25, 4  ;;  %s690_s6 = int_to_ptr.vmem [resolvable:$false] %s689_s6 }
  0x62   : > { %s691_s10 = scalar_lea.vmem %s690_s6, 512  ;;  %p692_p12 = scmp.lt.s32.totalorder %s991_s17, %s690_s6 }
  0x63   : > { %p687_p6 = pnand %p686_p13, %p911_p10  ;;  %p693_p11 = scmp.lt.s32.totalorder %s691_s10, %s685_s30 }
  0x65   : > { %p688_p8 = pneg %p687_p6  ;;  %p694_p0 = por %p693_p11, %p692_p12 }
  0x67   : > { %p695_p5 = pnand %p694_p0, %p688_p8 }
  0xe9   : > { %v277_v2 = vpop.xlane.xlu0 %276 }
  0xea   : > { %v279_v3 = vmul.f32 0.03125, %v277_v2 }
  0xec   : > { %v280_v4 = vsub.f32 %v273_v0, %v279_v3 }
  0xee   : > { %v281_v5 = vmul.f32 %v280_v4, %v280_v4 }
  0xf0   : > { %v282_v6 = vsel %vm274_vm0, %v281_v5, 0.0 }
  0xf1   : > { %283 = vadd.xlane.f32.xlu0 %v282_v6 }
 0x17e   : > { %v284_v10 = vpop.xlane.xlu0 %283 }
 0x17f   : > { %v285_v11 = vmul.f32 0.03125, %v284_v10 }
 0x181   : > { %v286_v12 = vadd.f32 1e-05, %v285_v11 }
 0x183   : > { %625 = vrsqrt.f32 %v286_v12 }
 0x18d   : > { %v626_v13 = vpop.eup %625 }
 0x18e   : > { %v288_v15 = vmul.f32 %v626_v13, %v280_v4 }
 0x190   : > { %v296_v17 = vmul.f32 %v513_v14, %v288_v15 }
 0x192   : > { %v304_v18 = vadd.f32 %v514_v16, %v296_v17 }
 0x194   : > { %v305_v19 = vpack.c.bf16 %v304_v18, %v304_v18 }
 0x196   : > { %538 = vmatmul.mubr.msk.bf16.vlgmr.msra.gmra.mrb[0].mxu0 %vm274_vm0, %v305_v19 }
 0x269   : > { %v366_v21 = vpop.f32.mrb[0].mxu0 }
 0x26a   : > { %v367_v22 = vadd.f32 %v515_v20, %v366_v21  ;;  %v539_v23 = vpop.f32.mrb[1].mxu0 }
 0x26b   : > { %v369_v24 = vpop.f32.mrb[2].mxu0 }
 0x26c   : > { %v372_v25 = vpack.c.bf16 %v367_v22, %v367_v22  ;;  %v540_v26 = vpop.f32.mrb[3].mxu0 }
 0x26e   : > { %388 = vrot.lane.b32.xlu0 %v372_v25, %s779_s7  ;;  %378 = vrot.lane.b32.xlu1 %v372_v25, %s780_s27  ;;  %374 = vst.msk [vmem:[%s271_s14] sm:$0xf] %vm373_vm2, %v372_v25 }
 0x272   : > { %383 = vrot.lane.b32.xlu1 %v372_v25, %s781_s16 }
 0x2e0   : > { %v389_v27 = vpop.permute.xlu0 %388  ;;  %v379_v28 = vpop.permute.xlu1 %378 }
 0x2e1   : > { %522 = vst.msk [vmem:[%s271_s14 + $0xc] sm:$0xf] %vm373_vm2, %v389_v27  ;;  %520 = vst.msk [vmem:[%s271_s14 + $0x4] sm:$0xf] %vm373_vm2, %v379_v28 }
 0x2e4   : > { %v384_v29 = vpop.permute.xlu1 %383 }
 0x2e5   : > { %521 = vst.msk [vmem:[%s271_s14 + $0x8] sm:$0xf] %vm373_vm2, %v384_v29 }
 0x2e6   : > { %698 = shalt.err (!%p695_p5)
}
 0x2e7   : > { %s699_s11 = scalar_lea.hbm %s998_s28, 256  ;;  %s703_s14 = scalar_lea.hbm %s1053_s5, 512 }
 0x2e8   : > { %p700_p9 = scmp.ne.s32.totalorder %s998_s28, %s699_s11  ;;  %p704_p7 = scmp.lt.u32.totalorder %s998_s28, %s1053_s5 }
 0x2e9   : > { %p705_p3 = scmp.lt.u32.totalorder %s703_s14, %s699_s11  ;;  %p707_p13 = scmp.lt.u32.totalorder %s699_s11, %s998_s28 }
 0x2ea   : > { %p701_p1 = pnand %p700_p9, %p911_p10 }
 0x2eb   : > { %p706_p4 = por %p705_p3, %p704_p7 }
 0x2ec   : > { %p702_p2 = pneg %p701_p1 }
 0x2ed   : > { %p708_p6 = por %p707_p13, %p706_p4 }
 0x2ef   : > { %p709_p8 = pnand %p708_p6, %p702_p2 }
 0x2f1   : > { %712 = shalt.err (!%p709_p8)
}
 0x2f2   : > { %s783_s24 = smov 64   ;;  %s784_s26 = smov 4  }
 0x2f3   : > { %547 = dma.vmem_to_hbm [thread:$0]  (%p911_p10), %s991_s17, 256, %s998_s28, %s394_s21, %s783_s24, %s783_s24, %s784_s26  }
 0x2f4 PF: > { %s423_s30 = sand.u32 1, %s751_s18   ;;  %p1071_p12 = scmp.ne.s32.totalorder %s1061_s29, 0 }
 0x2f5   : > { %p1072_p11 = scmp.ge.s32.totalorder %s771_s23, 2  ;;  %s424_s25 = scalar_lea.sflag [#allocation4], %s423_s30 }
 0x2f7   : > { %p558_p0 = pnand %p1072_p11, %p1071_p12 }
 0x2f9   : > { %746 = dma.done.wait (!%p558_p0), %s424_s25, 256  }
 0x2fa   : > { %748 = vsyncadd (!%p558_p0), %s424_s25, 4294967040  ;;  %s22_s23 = sadd.s32 1, %s771_s23   ;;  %s1073_s18 = smov %s755_s19 }
 0x2fb   : > { %p19_p5 = scmp.ge.s32.totalorder %s22_s23, 4   ;;  %s1074_s19 = smov %s759_s20 }
 0x2fc   : > { %s1075_s20 = smov %s920_s15  ;;  %s1076_s21 = smov %s767_s22 }
 0x2fd   : > { %s1077_s22 = smov %s1079_s9  ;;  %21 = sbr.rel (!%p19_p5) target bundleno = 7 (0x7), region = 92 }
 0x304   :  { %429 = vsyncpa [#allocation3], 1 }
 0x305   :  { %431 = vsyncpa [#allocation3 + $0x1], 1 }
 0x306   :  { %432 = vsyncpa [#allocation6], 1 }
 0x307   :  { %433 = vsyncpa [#allocation4], 1 }
 0x308   :  { %435 = vsyncpa [#allocation4 + $0x1], 1 }

</bundles_post_ra>
